<compile_context>
chip_gen: v7x
topology: tpu7x:2x2x1
jax: 0.10.0
libtpu: 0.0.40
codegen_flags: <defaults>
</compile_context>

<pallas_src>
import jax
import jax.numpy as jnp
from jax import lax
from jax.experimental import pallas as pl
from jax.experimental.pallas import tpu as pltpu

_MiB = 1024 * 1024


# ---------------------------------------------------------------------------
# helpers
# ---------------------------------------------------------------------------

def _round_up(x, m):
    return -(-int(x) // m) * m


def _vmem_plan():
    """Generation-aware (per-grid-step block budget, vmem_limit_bytes).

    Pallas double-buffers each side, so ~2x the per-step (in+out) block budget
    must fit the scoped-VMEM limit we request:
      * v7x-class (64 MiB physical VMEM):  ~20 MiB/step, limit 48 MiB.
      * v5e / v6e (128 MiB physical VMEM): ~14 MiB/step, limit raised to 36 MiB
        (v5e's default scoped limit is only 16 MiB, so raise it explicitly).
      * detection failure: 6 MiB/step, keep the compiler's default limit.
    """
    step, limit = 6 * _MiB, None
    try:
        info = pltpu.get_tpu_info()
        cap = None
        for attr in ("vmem_capacity_bytes", "vmem_size_bytes", "vmem_bytes"):
            cap = getattr(info, attr, None)
            if cap:
                break
        if cap:
            if cap <= 80 * _MiB:          # v7x-class: 64 MiB physical VMEM
                step, limit = 20 * _MiB, 48 * _MiB
            else:                         # v5e / v6e: 128 MiB physical VMEM
                step, limit = 14 * _MiB, 36 * _MiB
    except Exception:
        pass                              # no TPU info available: stay safe
    return step, limit


def _padded_row_bytes(sub, lane, dtype):
    """VMEM bytes of one leading-dim row of a (rows, sub, lane) block, with the
    sublane dim padded to 8/16/32 (4/2/1-byte dtypes) and the lane dim to 128."""
    itemsize = jnp.dtype(dtype).itemsize
    sub_mult = max(8, 32 // itemsize)
    return _round_up(sub, sub_mult) * _round_up(lane, 128) * itemsize


def _choose_bf_tile(BF, per_row_bytes, step_budget, min_steps):
    """Largest leading-dim tile whose (in+out) block footprint fits the per-step
    budget, capped so the cdiv grid has at least `min_steps` parallel steps."""
    by_budget = max(1, step_budget // max(1, per_row_bytes))
    by_steps = -(-BF // max(1, min_steps))          # cdiv(BF, min_steps)
    return max(1, min(BF, by_budget, by_steps))


# ---------------------------------------------------------------------------
# kernel
# ---------------------------------------------------------------------------

def _make_segment_kernel(hop, S, widths):
    K = len(widths)

    def kernel(x_ref, o_ref):
        # x_ref: (bf_tile, P, hop) ; o_ref: (bf_tile, S, chunk)
        # K static residue-class slab copies (K = 2 for GALR's 50% overlap):
        # no per-segment loop, no dynamic indices.  When hop % 128 == 0 every
        # store starts on a lane-tile boundary (unmasked vst); otherwise the
        # static k*hop lane offset costs masked stores which stay hidden under
        # the HBM DMAs.  A fully lane-dense store path for hop % 128 != 0 needs
        # either consumer fusion or an output-layout change at the call site.
        # TODO(synk): lane-dense fused/layout-changed variant for hop % 128 != 0.
        for k in range(K):
            w = widths[k]
            o_ref[:, :, k * hop:k * hop + w] = x_ref[:, k:k + S, :w]

    return kernel


# ---------------------------------------------------------------------------
# public wrapper + reference
# ---------------------------------------------------------------------------

def segment1d(x, chunk_size, hop_size, *, bf_tile=None):
    """x: (B, F, N) -> (B, F, S, chunk_size), S = (N - chunk)//hop + 1."""
    B, F, N = x.shape
    chunk, hop = int(chunk_size), int(hop_size)
    S = (N - chunk) // hop + 1
    assert S >= 1, "n_frames too small for chunk_size"

    # NOTE: K static copies; for extreme overlap (hop << chunk) compile time
    # grows linearly in K, but each copy is still a full slab (never an
    # S-iteration row loop).
    K = -(-chunk // hop)                              # ceil(chunk / hop)
    widths = [min(hop, chunk - k * hop) for k in range(K)]
    P = S + K - 1
    used = P * hop

    BF = B * F
    x2 = x.reshape(BF, N)
    # Align the trailing frame count with the (BF, P, hop) view.  GALR pads its
    # input so (N - chunk) % hop == 0, in which case used == N and both
    # reshapes are metadata-only.  Otherwise: one cheap XLA slice / (< hop) pad;
    # padded samples are provably never copied into any output window.
    if used == N:
        x_used = x2
    elif used < N:
        x_used = lax.slice_in_dim(x2, 0, used, axis=1)
    else:
        x_used = jnp.pad(x2, ((0, 0), (0, used - N)))
    x3 = x_used.reshape(BF, P, hop)

    step_budget, vmem_limit = _vmem_plan()
    per_row = (_padded_row_bytes(P, hop, x.dtype)
               + _padded_row_bytes(S, chunk, x.dtype))
    if bf_tile is None:
        # >= 4 parallel grid steps when possible (feeds both v7x TensorCores).
        bf_tile = _choose_bf_tile(BF, per_row, step_budget,
                                  min_steps=min(4, BF))
    bf_tile = max(1, min(int(bf_tile), BF))
    grid = (pl.cdiv(BF, bf_tile),)        # non-divisor tiles OK (partial tail block)

    itemsize = jnp.dtype(x.dtype).itemsize
    bytes_accessed = (BF * P * hop + BF * S * chunk) * itemsize

    out = pl.pallas_call(
        _make_segment_kernel(hop, S, widths),
        out_shape=jax.ShapeDtypeStruct((BF, S, chunk), x.dtype),
        grid_spec=pltpu.PrefetchScalarGridSpec(
            num_scalar_prefetch=0,
            grid=grid,
            # pipeline_mode=pl.Buffered(3) on the input is a few-% knob for
            # very short grids; left at default double-buffering (VMEM cost on v7x).
            in_specs=[pl.BlockSpec((bf_tile, P, hop), lambda i: (i, 0, 0))],
            out_specs=pl.BlockSpec((bf_tile, S, chunk), lambda i: (i, 0, 0)),
        ),
        compiler_params=pltpu.CompilerParams(
            dimension_semantics=("parallel",),
            vmem_limit_bytes=vmem_limit),
        cost_estimate=pl.CostEstimate(
            flops=0, transcendentals=0, bytes_accessed=bytes_accessed),
    )(x3)
    return out.reshape(B, F, S, chunk)


def segment1d_ref(x, chunk_size, hop_size):
    """Pure-JAX reference mirroring F.unfold semantics."""
    B, F, N = x.shape
    S = (N - chunk_size) // hop_size + 1
    idx = jnp.arange(S)[:, None] * hop_size + jnp.arange(chunk_size)[None, :]
    return x[:, :, idx]  # (B, F, S, chunk)


if __name__ == "__main__":
    key = jax.random.PRNGKey(0)
    k1, k2 = jax.random.split(key)

    # GALR-style 50% overlap (chunk=4, hop=2); B=2, F=8, N=16 -> S=7, K=2.
    B, F, N = 2, 8, 16
    chunk_size, hop_size = 4, 2
    x = jax.random.normal(k1, (B, F, N), dtype=jnp.float32)

    out = jax.block_until_ready(segment1d(x, chunk_size, hop_size))
    ref = segment1d_ref(x, chunk_size, hop_size)
    assert out.shape == ref.shape == (B, F, 7, chunk_size), (out.shape, ref.shape)
    assert jnp.array_equal(out, ref), "50%-overlap path mismatch vs reference"

    # Non-divisor tile -> cdiv grid with a partial trailing block.
    out_tail = jax.block_until_ready(segment1d(x, chunk_size, hop_size, bf_tile=6))
    assert jnp.array_equal(out_tail, ref), "partial-tail-block path mismatch"

    # bf16 input exercises the dtype-aware footprint estimate (pure copy -> exact).
    xb = x.astype(jnp.bfloat16)
    outb = jax.block_until_ready(segment1d(xb, chunk_size, hop_size))
    refb = segment1d_ref(xb, chunk_size, hop_size)
    assert jnp.array_equal(outb, refb), "bf16 path mismatch vs reference"

    # hop does not divide chunk (chunk=5, hop=2), N=17 -> S=7, K=3 with a
    # partial last residue class and a 1-sample wrapper pad.
    x2 = jax.random.normal(k2, (B, F, 17), dtype=jnp.float32)
    out2 = jax.block_until_ready(segment1d(x2, 5, 2))
    ref2 = segment1d_ref(x2, 5, 2)
    assert out2.shape == ref2.shape, (out2.shape, ref2.shape)
    assert jnp.array_equal(out2, ref2), "ragged-overlap path mismatch vs reference"

    print("KERNEL_OK")
</pallas_src>

<mosaic_0001>
module attributes {stable_mosaic.version = 11 : i64} {
  func.func @kernel(%arg0: i32, %arg1: memref<4x8x2xf32, #tpu.memory_space<vmem>>, %arg2: memref<4x7x4xf32, #tpu.memory_space<vmem>>) attributes {dimension_semantics = [#tpu.dimension_semantics<parallel>], iteration_bounds = array<i64: 4>, scalar_prefetch = 0 : i64, scratch_operands = 0 : i64, tpu.core_type = #tpu.core_type<tc>, window_params = [{transform_indices = @transform_0, window_bounds = array<i64: 4, 8, 2>}, {transform_indices = @transform_1, window_bounds = array<i64: 4, 7, 4>}]} {
    %c0 = arith.constant 0 : index
    %c0_0 = arith.constant 0 : index
    %c0_1 = arith.constant 0 : index
    %0 = vector.load %arg1[%c0, %c0_0, %c0_1] : memref<4x8x2xf32, #tpu.memory_space<vmem>>, vector<4x7x2xf32>
    %c0_2 = arith.constant 0 : index
    %c0_3 = arith.constant 0 : index
    %c0_4 = arith.constant 0 : index
    %1 = vector.load %arg2[%c0_2, %c0_3, %c0_4] : memref<4x7x4xf32, #tpu.memory_space<vmem>>, vector<4x7x2xf32>
    tpu.vector_store %arg2[%c0_2, %c0_3, %c0_4], %0 {strides = array<i32>} : memref<4x7x4xf32, #tpu.memory_space<vmem>>, vector<4x7x2xf32>,
    %c0_5 = arith.constant 0 : index
    %c1 = arith.constant 1 : index
    %c0_6 = arith.constant 0 : index
    %2 = vector.load %arg1[%c0_5, %c1, %c0_6] : memref<4x8x2xf32, #tpu.memory_space<vmem>>, vector<4x7x2xf32>
    %c0_7 = arith.constant 0 : index
    %c0_8 = arith.constant 0 : index
    %c2 = arith.constant 2 : index
    %3 = vector.load %arg2[%c0_7, %c0_8, %c2] : memref<4x7x4xf32, #tpu.memory_space<vmem>>, vector<4x7x2xf32>
    tpu.vector_store %arg2[%c0_7, %c0_8, %c2], %2 {strides = array<i32>} : memref<4x7x4xf32, #tpu.memory_space<vmem>>, vector<4x7x2xf32>,
    return
  }
  func.func @transform_0(%arg0: i32) -> (i32, i32, i32) {
    %c0_i32 = arith.constant 0 : i32
    %c0_i32_0 = arith.constant 0 : i32
    %c0_i32_1 = arith.constant 0 : i32
    return %arg0, %c0_i32, %c0_i32_0 : i32, i32, i32
  }
  func.func @transform_1(%arg0: i32) -> (i32, i32, i32) {
    %c0_i32 = arith.constant 0 : i32
    %c0_i32_0 = arith.constant 0 : i32
    %c0_i32_1 = arith.constant 0 : i32
    return %arg0, %c0_i32, %c0_i32_0 : i32, i32, i32
  }
}

</mosaic_0001>

<bundles_post_ra>
// kernel: tpu_custom_call.1
= control target key start
LH: loop header
LB: loop body
LE: loop exit
PB: predicated region body
PF: predicated region fallthrough
CT: control target
= control target key end

     0   :  { %s249_s6 = smov 0   ;;  %s266_s0 = inlined_call_operand.vmem [shape: f32[16,8,2], index: 0, kind: input, shape index: {}]   ;;  %s267_s1 = inlined_call_operand.vmem [shape: f32[16,7,4], index: 1, kind: output, shape index: {}]  }
   0x1 LB: > { %s210_s7 = sadd.s32 4294967295, %s236_s6   ;;  %p214_p0 = scmp.ge.s32.totalorder %s236_s6, 1  ;;  %s236_s6 = sphi %s249_s6, %s11_s6  }
   0x2   : > { %p88_p1 = scmp.lt.s32.totalorder %s236_s6, 5 }
   0x4   : > { %p89_p2 = pnand %p214_p0, %p88_p1 }
   0x5   : > { %s215_s8 = sshll.u32 (!%p89_p2), %s210_s7, 2  ;;  %vm124_vm0 = vcmask (!%p89_p2), 14336   ;;  %s238_s16 = smov (!%p89_p2), 2   ;;  %vm149_vm1 = vcmask (!%p89_p2), 30736  }
   0x6   : > { %92 = sbr.rel (%p89_p2) target bundleno = 137 (0x89), region = 24  ;;  %p109_p3 = scmp.lt.s32.totalorder (!%p89_p2), %s215_s8, 15 }
   0xd   : > { %s269_s8 = smov (!%p109_p3, %s215_s8), 15 }
   0xe   : > { %s216_s9 = sshll.u32 %s269_s8, 3 }
   0xf   : > { %s112_s12 = scalar_lea.vmem %s266_s0, %s216_s9  ;;  %s118_s15 = scalar_lea.vmem %s267_s1, %s216_s9 }
  0x10   : > { %v131_v0 = vld [vmem:[%s112_s12 + $0x11] sm:$0x7f]  ;;  %v129_v1 = vld [vmem:[%s112_s12 + $0x1] sm:$0x7f]  ;;  %v132_v2 = vld [vmem:[%s112_s12 + $0x19] sm:$0x7f] }
  0x11   : > { %141 = vrot.lane.b32.xlu1 %v131_v0, %s238_s16  ;;  %137 = vrot.lane.b32.xlu0 %v129_v1, %s238_s16  ;;  %v130_v3 = vld [vmem:[%s112_s12 + $0x9] sm:$0x7f]  ;;  %v122_v4 = vld [vmem:[%s112_s12 + $0x10] sm:$0x7f] }
  0x12   : > { %127 = vst.msk [vmem:[%s118_s15 + $0x10] sm:$0x7f] %vm124_vm0, %v122_v4  ;;  %v120_v5 = vld [vmem:[%s112_s12] sm:$0x7f]  ;;  %v123_v6 = vld [vmem:[%s112_s12 + $0x18] sm:$0x7f] }
  0x13   : > { %v121_v7 = vld [vmem:[%s112_s12 + $0x8] sm:$0x7f]  ;;  %125 = vst.msk [vmem:[%s118_s15] sm:$0x7f] %vm124_vm0, %v120_v5  ;;  %128 = vst.msk [vmem:[%s118_s15 + $0x18] sm:$0x7f] %vm124_vm0, %v123_v6 }
  0x14   : > { %126 = vst.msk [vmem:[%s118_s15 + $0x8] sm:$0x7f] %vm124_vm0, %v121_v7 }
  0x15   : > { %143 = vrot.lane.b32.xlu1 %v132_v2, %s238_s16  ;;  %139 = vrot.lane.b32.xlu0 %v130_v3, %s238_s16 }
  0x83   : > { %v142_v8 = vpop.permute.xlu1 %141  ;;  %v138_v9 = vpop.permute.xlu0 %137 }
  0x84   : > { %152 = vst.msk [vmem:[%s118_s15 + $0x10] sm:$0x7f] %vm149_vm1, %v142_v8  ;;  %150 = vst.msk [vmem:[%s118_s15] sm:$0x7f] %vm149_vm1, %v138_v9 }
  0x87   : > { %v144_v10 = vpop.permute.xlu1 %143  ;;  %v140_v11 = vpop.permute.xlu0 %139 }
  0x88   : > { %153 = vst.msk [vmem:[%s118_s15 + $0x18] sm:$0x7f] %vm149_vm1, %v144_v10  ;;  %151 = vst.msk [vmem:[%s118_s15 + $0x8] sm:$0x7f] %vm149_vm1, %v140_v11 }
  0x89 PF: > { %s11_s6 = sadd.s32 1, %s236_s6  }
  0x8a   : > { %p8_p4 = scmp.ge.s32.totalorder %s11_s6, 6  }
  0x8c   :  { %10 = sbr.rel (!%p8_p4) target bundleno = 1 (0x1), region = 54 }

</bundles_post_ra>
